<compile_context>
chip_gen: v5e
topology: v5e:2x2
jax: 0.10.0
libtpu: 0.0.40
codegen_flags: <defaults>
</compile_context>

<pallas_src>
import math

import jax
import jax.numpy as jnp
from jax.experimental import pallas as pl
from jax.experimental.pallas import tpu as pltpu


def _make_split_kernel(fold: int, theta_dim: int, backcast_size: int,
                       forecast_size: int):
    """Kernel over a (tb, fold*theta_dim) tile of the lane-folded theta view."""

    def kernel(theta_ref, backcast_ref, forecast_ref):
        # Single load of the tile; both outputs come from this value so the
        # (possibly partially masked) vld happens exactly once.
        t = theta_ref[...]
        backs = [t[:, f * theta_dim: f * theta_dim + backcast_size]
                 for f in range(fold)]
        fores = [t[:, (f + 1) * theta_dim - forecast_size: (f + 1) * theta_dim]
                 for f in range(fold)]
        # De-interleave (lane shifts / selects ride the XLU slot) so the final
        # stores are full-lane-width, unmasked vst.
        backcast_ref[...] = (backs[0] if fold == 1
                             else jnp.concatenate(backs, axis=-1))
        forecast_ref[...] = (fores[0] if fold == 1
                             else jnp.concatenate(fores, axis=-1))

    return kernel


def _fold_factor(batch: int, backcast_size: int, forecast_size: int) -> int:
    """Smallest F with F*backcast % 128 == 0 and F*forecast % 128 == 0.

    Falls back to 1 (no fold) when F does not divide the batch.
    """
    f = max(128 // math.gcd(128, backcast_size),
            128 // math.gcd(128, forecast_size))
    if f <= 1:
        return 1
    if batch % f == 0:
        return f
    return 1


def _vmem_budget_bytes() -> int:
    """Generation-aware VMEM budget for the double-buffered working set."""
    budget = 12 * 1024 * 1024          # conservative, safe on every generation
    try:
        vmem = pltpu.get_tpu_info().vmem_capacity_bytes
        if vmem >= 96 * 1024 * 1024:   # v5e / v6e: 128 MiB physical per TC
            budget = 24 * 1024 * 1024
        else:                          # v7x: 64 MiB physical per TC
            budget = 20 * 1024 * 1024
    except Exception:                  # noqa: BLE001 - info query is advisory
        pass
    return budget


def _pick_batch_tile(rows, in_w, back_w, fore_w, itemsize, budget,
                     max_rows_per_tile=None):
    """Pick a (packed-)row tile size: as big as the VMEM budget allows."""
    sub = max(8, 32 // itemsize)                 # sublane packing granularity
    lanes = lambda n: ((n + 127) // 128) * 128   # lane padding per buffer
    # Double-buffered footprint per row: input tile + both output tiles.
    row_bytes = 2 * (lanes(in_w) + lanes(back_w) + lanes(fore_w)) * itemsize
    tb = max(1, budget // row_bytes)             # payload-sized, no fixed cap
    if max_rows_per_tile is not None:
        tb = min(tb, max_rows_per_tile)
    if tb >= rows:
        return rows                              # single full block (legal)
    tb = max(sub, (tb // sub) * sub)             # multiple of sublane packing
    return min(tb, rows)


def _dimension_semantics():
    """(preferred, fallback) dimension semantics for the batch-tile axis."""
    try:
        kind = jax.devices()[0].device_kind.lower()
    except Exception:  # noqa: BLE001
        kind = ""
    if "v7" in kind or "7x" in kind:
        # v7x: 2 TensorCores/chip; CORE_PARALLEL actually splits the grid axis
        # across them (plain "parallel" does not change codegen).
        return (pltpu.CORE_PARALLEL,), ("parallel",)
    return ("parallel",), None


def generic_basis(theta: jax.Array, backcast_size: int, forecast_size: int,
                  *, max_rows_per_tile: int | None = None):
    """Pallas implementation of GenericBasis.forward."""
    assert theta.ndim == 2
    batch, theta_dim = theta.shape
    # Zero-width slices would create zero-width blocks, which Mosaic rejects.
    assert 0 < backcast_size <= theta_dim
    assert 0 < forecast_size <= theta_dim

    fold = _fold_factor(batch, backcast_size, forecast_size)
    rows = batch // fold
    in_w = fold * theta_dim
    back_w = fold * backcast_size
    fore_w = fold * forecast_size

    budget = _vmem_budget_bytes()
    tb = _pick_batch_tile(rows, in_w, back_w, fore_w, theta.dtype.itemsize,
                          budget, max_rows_per_tile)
    grid = (pl.cdiv(rows, tb),)

    # Free HBM view: theta is row-contiguous, so folding F consecutive logical
    # rows into one packed row is just a reshape (no data movement).
    theta_view = theta.reshape(rows, in_w)

    kernel = _make_split_kernel(fold, theta_dim, backcast_size, forecast_size)
    out_shapes = (
        jax.ShapeDtypeStruct((rows, back_w), theta.dtype),
        jax.ShapeDtypeStruct((rows, fore_w), theta.dtype),
    )
    vmem_limit = min(budget + 8 * 1024 * 1024, 48 * 1024 * 1024)

    def run(dim_sem):
        return pl.pallas_call(
            kernel,
            out_shape=out_shapes,
            grid=grid,
            in_specs=[pl.BlockSpec((tb, in_w), lambda i: (i, 0))],
            out_specs=(
                pl.BlockSpec((tb, back_w), lambda i: (i, 0)),
                pl.BlockSpec((tb, fore_w), lambda i: (i, 0)),
            ),
            compiler_params=pltpu.CompilerParams(
                dimension_semantics=dim_sem,
                vmem_limit_bytes=vmem_limit),
        )(theta_view)

    preferred, fallback = _dimension_semantics()
    if fallback is None:
        back_p, fore_p = run(preferred)
    else:
        try:
            back_p, fore_p = run(preferred)
        except Exception:  # noqa: BLE001 - CORE_PARALLEL is best-effort
            back_p, fore_p = run(fallback)

    # Free reshapes back to the logical (batch, *) layout.
    return (back_p.reshape(batch, backcast_size),
            fore_p.reshape(batch, forecast_size))


if __name__ == "__main__":
    backcast_size = 16
    forecast_size = 8
    theta_dim = backcast_size + forecast_size  # typical N-BEATS generic block

    # Lane-folded path (batch divisible by the fold factor F=16).
    batch = 32
    key = jax.random.PRNGKey(0)
    theta = jax.random.normal(key, (batch, theta_dim), dtype=jnp.float32)

    backcast, forecast = generic_basis(theta, backcast_size, forecast_size)
    jax.block_until_ready((backcast, forecast))
    assert backcast.shape == (batch, backcast_size)
    assert forecast.shape == (batch, forecast_size)
    assert jnp.array_equal(backcast, theta[:, :backcast_size])
    assert jnp.array_equal(forecast, theta[:, -forecast_size:])

    # Lane-folded + multi-tile (grid > 1, pipelined) path.
    theta2 = jax.random.normal(jax.random.PRNGKey(0), (256, theta_dim),
                               dtype=jnp.float32)
    b2, f2 = generic_basis(theta2, backcast_size, forecast_size,
                           max_rows_per_tile=8)
    jax.block_until_ready((b2, f2))
    assert jnp.array_equal(b2, theta2[:, :backcast_size])
    assert jnp.array_equal(f2, theta2[:, -forecast_size:])

    # Un-folded fallback (batch not divisible by F) with a ragged last tile.
    theta3 = jax.random.normal(jax.random.PRNGKey(0), (40, theta_dim),
                               dtype=jnp.float32)
    b3, f3 = generic_basis(theta3, backcast_size, forecast_size,
                           max_rows_per_tile=16)
    jax.block_until_ready((b3, f3))
    assert jnp.array_equal(b3, theta3[:, :backcast_size])
    assert jnp.array_equal(f3, theta3[:, -forecast_size:])

    print("KERNEL_OK")
</pallas_src>

<mosaic_0001>
module attributes {stable_mosaic.version = 11 : i64} {
  func.func @kernel(%arg0: i32, %arg1: memref<2x384xf32, #tpu.memory_space<vmem>>, %arg2: memref<2x256xf32, #tpu.memory_space<vmem>>, %arg3: memref<2x128xf32, #tpu.memory_space<vmem>>) attributes {dimension_semantics = [#tpu.dimension_semantics<parallel>], iteration_bounds = array<i64: 1>, scalar_prefetch = 0 : i64, scratch_operands = 0 : i64, tpu.core_type = #tpu.core_type<tc>, window_params = [{transform_indices = @transform_0, window_bounds = array<i64: 2, 384>}, {transform_indices = @transform_1, window_bounds = array<i64: 2, 256>}, {transform_indices = @transform_2, window_bounds = array<i64: 2, 128>}]} {
    %c0 = arith.constant 0 : index
    %c0_0 = arith.constant 0 : index
    %0 = vector.load %arg1[%c0, %c0_0] : memref<2x384xf32, #tpu.memory_space<vmem>>, vector<2x384xf32>
    %1 = vector.extract_strided_slice %0 {offsets = [0, 0], sizes = [2, 16], strides = [1, 1]} : vector<2x384xf32> to vector<2x16xf32>
    %2 = vector.extract_strided_slice %0 {offsets = [0, 24], sizes = [2, 16], strides = [1, 1]} : vector<2x384xf32> to vector<2x16xf32>
    %3 = vector.extract_strided_slice %0 {offsets = [0, 48], sizes = [2, 16], strides = [1, 1]} : vector<2x384xf32> to vector<2x16xf32>
    %4 = vector.extract_strided_slice %0 {offsets = [0, 72], sizes = [2, 16], strides = [1, 1]} : vector<2x384xf32> to vector<2x16xf32>
    %5 = vector.extract_strided_slice %0 {offsets = [0, 96], sizes = [2, 16], strides = [1, 1]} : vector<2x384xf32> to vector<2x16xf32>
    %6 = vector.extract_strided_slice %0 {offsets = [0, 120], sizes = [2, 16], strides = [1, 1]} : vector<2x384xf32> to vector<2x16xf32>
    %7 = vector.extract_strided_slice %0 {offsets = [0, 144], sizes = [2, 16], strides = [1, 1]} : vector<2x384xf32> to vector<2x16xf32>
    %8 = vector.extract_strided_slice %0 {offsets = [0, 168], sizes = [2, 16], strides = [1, 1]} : vector<2x384xf32> to vector<2x16xf32>
    %9 = vector.extract_strided_slice %0 {offsets = [0, 192], sizes = [2, 16], strides = [1, 1]} : vector<2x384xf32> to vector<2x16xf32>
    %10 = vector.extract_strided_slice %0 {offsets = [0, 216], sizes = [2, 16], strides = [1, 1]} : vector<2x384xf32> to vector<2x16xf32>
    %11 = vector.extract_strided_slice %0 {offsets = [0, 240], sizes = [2, 16], strides = [1, 1]} : vector<2x384xf32> to vector<2x16xf32>
    %12 = vector.extract_strided_slice %0 {offsets = [0, 264], sizes = [2, 16], strides = [1, 1]} : vector<2x384xf32> to vector<2x16xf32>
    %13 = vector.extract_strided_slice %0 {offsets = [0, 288], sizes = [2, 16], strides = [1, 1]} : vector<2x384xf32> to vector<2x16xf32>
    %14 = vector.extract_strided_slice %0 {offsets = [0, 312], sizes = [2, 16], strides = [1, 1]} : vector<2x384xf32> to vector<2x16xf32>
    %15 = vector.extract_strided_slice %0 {offsets = [0, 336], sizes = [2, 16], strides = [1, 1]} : vector<2x384xf32> to vector<2x16xf32>
    %16 = vector.extract_strided_slice %0 {offsets = [0, 360], sizes = [2, 16], strides = [1, 1]} : vector<2x384xf32> to vector<2x16xf32>
    %17 = vector.extract_strided_slice %0 {offsets = [0, 16], sizes = [2, 8], strides = [1, 1]} : vector<2x384xf32> to vector<2x8xf32>
    %18 = vector.extract_strided_slice %0 {offsets = [0, 40], sizes = [2, 8], strides = [1, 1]} : vector<2x384xf32> to vector<2x8xf32>
    %19 = vector.extract_strided_slice %0 {offsets = [0, 64], sizes = [2, 8], strides = [1, 1]} : vector<2x384xf32> to vector<2x8xf32>
    %20 = vector.extract_strided_slice %0 {offsets = [0, 88], sizes = [2, 8], strides = [1, 1]} : vector<2x384xf32> to vector<2x8xf32>
    %21 = vector.extract_strided_slice %0 {offsets = [0, 112], sizes = [2, 8], strides = [1, 1]} : vector<2x384xf32> to vector<2x8xf32>
    %22 = vector.extract_strided_slice %0 {offsets = [0, 136], sizes = [2, 8], strides = [1, 1]} : vector<2x384xf32> to vector<2x8xf32>
    %23 = vector.extract_strided_slice %0 {offsets = [0, 160], sizes = [2, 8], strides = [1, 1]} : vector<2x384xf32> to vector<2x8xf32>
    %24 = vector.extract_strided_slice %0 {offsets = [0, 184], sizes = [2, 8], strides = [1, 1]} : vector<2x384xf32> to vector<2x8xf32>
    %25 = vector.extract_strided_slice %0 {offsets = [0, 208], sizes = [2, 8], strides = [1, 1]} : vector<2x384xf32> to vector<2x8xf32>
    %26 = vector.extract_strided_slice %0 {offsets = [0, 232], sizes = [2, 8], strides = [1, 1]} : vector<2x384xf32> to vector<2x8xf32>
    %27 = vector.extract_strided_slice %0 {offsets = [0, 256], sizes = [2, 8], strides = [1, 1]} : vector<2x384xf32> to vector<2x8xf32>
    %28 = vector.extract_strided_slice %0 {offsets = [0, 280], sizes = [2, 8], strides = [1, 1]} : vector<2x384xf32> to vector<2x8xf32>
    %29 = vector.extract_strided_slice %0 {offsets = [0, 304], sizes = [2, 8], strides = [1, 1]} : vector<2x384xf32> to vector<2x8xf32>
    %30 = vector.extract_strided_slice %0 {offsets = [0, 328], sizes = [2, 8], strides = [1, 1]} : vector<2x384xf32> to vector<2x8xf32>
    %31 = vector.extract_strided_slice %0 {offsets = [0, 352], sizes = [2, 8], strides = [1, 1]} : vector<2x384xf32> to vector<2x8xf32>
    %32 = vector.extract_strided_slice %0 {offsets = [0, 376], sizes = [2, 8], strides = [1, 1]} : vector<2x384xf32> to vector<2x8xf32>
    %33 = tpu.concatenate %1, %2, %3, %4, %5, %6, %7, %8, %9, %10, %11, %12, %13, %14, %15, %16 in 1 : vector<2x16xf32>, vector<2x16xf32>, vector<2x16xf32>, vector<2x16xf32>, vector<2x16xf32>, vector<2x16xf32>, vector<2x16xf32>, vector<2x16xf32>, vector<2x16xf32>, vector<2x16xf32>, vector<2x16xf32>, vector<2x16xf32>, vector<2x16xf32>, vector<2x16xf32>, vector<2x16xf32>, vector<2x16xf32> -> vector<2x256xf32>
    %c0_1 = arith.constant 0 : index
    %c0_2 = arith.constant 0 : index
    %34 = vector.load %arg2[%c0_1, %c0_2] : memref<2x256xf32, #tpu.memory_space<vmem>>, vector<2x256xf32>
    tpu.vector_store %arg2[%c0_1, %c0_2], %33 {strides = array<i32>} : memref<2x256xf32, #tpu.memory_space<vmem>>, vector<2x256xf32>,
    %35 = tpu.concatenate %17, %18, %19, %20, %21, %22, %23, %24, %25, %26, %27, %28, %29, %30, %31, %32 in 1 : vector<2x8xf32>, vector<2x8xf32>, vector<2x8xf32>, vector<2x8xf32>, vector<2x8xf32>, vector<2x8xf32>, vector<2x8xf32>, vector<2x8xf32>, vector<2x8xf32>, vector<2x8xf32>, vector<2x8xf32>, vector<2x8xf32>, vector<2x8xf32>, vector<2x8xf32>, vector<2x8xf32>, vector<2x8xf32> -> vector<2x128xf32>
    %c0_3 = arith.constant 0 : index
    %c0_4 = arith.constant 0 : index
    %36 = vector.load %arg3[%c0_3, %c0_4] : memref<2x128xf32, #tpu.memory_space<vmem>>, vector<2x128xf32>
    tpu.vector_store %arg3[%c0_3, %c0_4], %35 {strides = array<i32>} : memref<2x128xf32, #tpu.memory_space<vmem>>, vector<2x128xf32>,
    return
  }
  func.func @transform_0(%arg0: i32) -> (i32, i32) {
    %c0_i32 = arith.constant 0 : i32
    %c0_i32_0 = arith.constant 0 : i32
    return %arg0, %c0_i32 : i32, i32
  }
  func.func @transform_1(%arg0: i32) -> (i32, i32) {
    %c0_i32 = arith.constant 0 : i32
    %c0_i32_0 = arith.constant 0 : i32
    return %arg0, %c0_i32 : i32, i32
  }
  func.func @transform_2(%arg0: i32) -> (i32, i32) {
    %c0_i32 = arith.constant 0 : i32
    %c0_i32_0 = arith.constant 0 : i32
    return %arg0, %c0_i32 : i32, i32
  }
}

</mosaic_0001>

<bundles_post_ra>
// kernel: tpu_custom_call.1
= control target key start
LH: loop header
LB: loop body
LE: loop exit
PB: predicated region body
PF: predicated region fallthrough
CT: control target
= control target key end

     0   :  { %8 = vsyncpa [#allocation3], 0  ;;  %s487_s0 = inlined_call_operand.hbm [shape: f32[2,384], index: 0, kind: input, shape index: {}]   ;;  %s488_s1 = inlined_call_operand.hbm [shape: f32[2,256], index: 1, kind: output, shape index: {0}]   ;;  %s489_s2 = inlined_call_operand.hbm [shape: f32[2,128], index: 2, kind: output, shape index: {1}]  }
   0x1   :  { %9 = vsyncpa [#allocation4], 0 }
   0x2   :  { %10 = vsyncpa [#allocation7], 0  ;;  %s16_s11 = sshll.u32 %s487_s0, 4  ;;  %s364_s12 = smov [#allocation2]   ;;  %s17_s11 = int_to_ptr.hbm [resolvable:$true] %s16_s11 }
   0x3   :  { %s18_s13 = sshll.u32 %s364_s12, 4  ;;  %s19_s13 = int_to_ptr.vmem [resolvable:$true] %s18_s13 }
   0x4   :  { %21 = dma.hbm_to_vmem [thread:$0]  %s17_s11, 96, %s19_s13, [#allocation3]  }
   0x5   :  { %358 = dma.done.wait [#allocation3], 96  }
   0x6   :  { %359 = vsyncadd [#allocation3], 4294967200  ;;  %v400_v0 = vld [vmem:[#allocation2] sm:$0x3f]  ;;  %s365_s14 = smov 120   ;;  %s366_s0 = smov 112  }
   0x7   :  { %28 = vst [vmem:[#allocation1] ss:$4 sm:$0xff] %v400_v0  ;;  %s367_s15 = smov 104   ;;  %s368_s16 = smov 96   ;;  %vm108_vm0 = vcmask 130048   ;;  %vm110_vm1 = vcmask 261120  }
   0x8   :  { %s369_s17 = smov 88   ;;  %s370_s18 = smov 80   ;;  %vm112_vm2 = vcmask 392192   ;;  %vm114_vm3 = vcmask 523264   ;;  %vm116_vm4 = vcmask 654336   ;;  %vm55_vm5 = vcmask 719872  }
   0x9   :  { %s371_s19 = smov 72   ;;  %s372_s20 = smov 64   ;;  %vm118_vm6 = vcmask 785408   ;;  %vm120_vm7 = vcmask 916480   ;;  %vm132_vm8 = vcmask 1041408   ;;  %vm212_vm9 = vcmask 64512  }
   0xa   :  { %s373_s21 = smov 56   ;;  %s374_s22 = smov 48   ;;  %vm215_vm10 = vcmask 195584   ;;  %vm218_vm11 = vcmask 326656   ;;  %vm221_vm12 = vcmask 457728   ;;  %vm224_vm13 = vcmask 588800  }
   0xb   :  { %s375_s23 = smov 40   ;;  %s376_s24 = smov 32   ;;  %vm229_vm14 = vcmask 850944   ;;  %vm232_vm15 = vcmask 982016  }
   0xc   :  { %s377_s25 = smov 24   ;;  %s378_s26 = smov 16  }
   0xd   :  { %s379_s27 = smov 8   ;;  %s380_s28 = smov [#allocation5]  }
   0xe   :  { %v29_v1 = vld.sshfl [vmem:[#allocation1] sm:$0xff pattern:$0x73625140]  ;;  %s240_s29 = sshll.u32 %s380_s28, 4  ;;  %s242_s4 = sshll.u32 %s488_s1, 4  ;;  %s241_s29 = int_to_ptr.vmem [resolvable:$true] %s240_s29  ;;  %s243_s4 = int_to_ptr.hbm [resolvable:$true] %s242_s4 }
   0xf   :  { %33 = vst [vmem:[#allocation1] ss:$4 sm:$0xff] %v400_v0  ;;  %30 = vrot.lane.b32.xlu0 %v29_v1, %s365_s14  ;;  %s381_s1 = smov [#allocation6]   ;;  %s253_s8 = sshll.u32 %s489_s2, 4  ;;  %s254_s8 = int_to_ptr.hbm [resolvable:$true] %s253_s8 }
  0x10   :  { %s251_s5 = sshll.u32 %s381_s1, 4  ;;  %s252_s5 = int_to_ptr.vmem [resolvable:$true] %s251_s5 }
  0x16   :  { %v34_v2 = vld.sshfl [vmem:[#allocation1] sm:$0xff pattern:$0x73625140] }
  0x17   :  { %38 = vst [vmem:[#allocation1] ss:$4 sm:$0xff] %v400_v0  ;;  %35 = vrot.lane.b32.xlu0 %v34_v2, %s366_s0 }
  0x1e   :  { %v39_v3 = vld.sshfl [vmem:[#allocation1] sm:$0xff pattern:$0x73625140] }
  0x1f   :  { %40 = vrot.lane.b32.xlu1 %v39_v3, %s367_s15  ;;  %43 = vst [vmem:[#allocation1] ss:$4 sm:$0xff] %v400_v0 }
  0x26   :  { %v44_v4 = vld.sshfl [vmem:[#allocation1] sm:$0xff pattern:$0x73625140] }
  0x27   :  { %45 = vrot.lane.b32.xlu1 %v44_v4, %s368_s16  ;;  %48 = vst [vmem:[#allocation1] ss:$4 sm:$0xff] %v400_v0 }
  0x2e   :  { %v49_v5 = vld.sshfl [vmem:[#allocation1] sm:$0xff pattern:$0x73625140]  ;;  %v50_v6 = vld.sshfl [vmem:[#allocation1 + $0x8] sm:$0xff pattern:$0x73625140] }
  0x2f   :  { %58 = vst [vmem:[#allocation1] ss:$4 sm:$0xff] %v400_v0  ;;  %51 = vrot.lane.b32.xlu2 %v49_v5, %s369_s17 }
  0x36   :  { %v59_v7 = vld.sshfl [vmem:[#allocation1 + $0x8] sm:$0xff pattern:$0x73625140] }
  0x37   :  { %63 = vst [vmem:[#allocation1] ss:$4 sm:$0xff] %v400_v0  ;;  %60 = vrot.lane.b32.xlu0 %v59_v7, %s370_s18  ;;  %53 = vrot.lane.b32.xlu2 %v50_v6, %s369_s17 }
  0x3e   :  { %v64_v8 = vld.sshfl [vmem:[#allocation1 + $0x8] sm:$0xff pattern:$0x73625140] }
  0x3f   :  { %65 = vrot.lane.b32.xlu1 %v64_v8, %s371_s19  ;;  %68 = vst [vmem:[#allocation1] ss:$4 sm:$0xff] %v400_v0 }
  0x46   :  { %v69_v9 = vld.sshfl [vmem:[#allocation1 + $0x8] sm:$0xff pattern:$0x73625140] }
  0x47   :  { %73 = vst [vmem:[#allocation1] ss:$4 sm:$0xff] %v400_v0  ;;  %70 = vrot.lane.b32.xlu2 %v69_v9, %s372_s20 }
  0x4e   :  { %v74_v10 = vld.sshfl [vmem:[#allocation1 + $0x8] sm:$0xff pattern:$0x73625140] }
  0x4f   :  { %78 = vst [vmem:[#allocation1] ss:$4 sm:$0xff] %v400_v0  ;;  %75 = vrot.lane.b32.xlu0 %v74_v10, %s373_s21 }
  0x56   :  { %v79_v11 = vld.sshfl [vmem:[#allocation1 + $0x8] sm:$0xff pattern:$0x73625140] }
  0x57   :  { %80 = vrot.lane.b32.xlu1 %v79_v11, %s374_s22  ;;  %83 = vst [vmem:[#allocation1] ss:$4 sm:$0xff] %v400_v0 }
  0x5e   :  { %v84_v12 = vld.sshfl [vmem:[#allocation1 + $0x10] sm:$0xff pattern:$0x73625140] }
  0x5f   :  { %88 = vst [vmem:[#allocation1] ss:$4 sm:$0xff] %v400_v0  ;;  %85 = vrot.lane.b32.xlu2 %v84_v12, %s375_s23 }
  0x66   :  { %v89_v13 = vld.sshfl [vmem:[#allocation1 + $0x10] sm:$0xff pattern:$0x73625140] }
  0x67   :  { %93 = vst [vmem:[#allocation1] ss:$4 sm:$0xff] %v400_v0  ;;  %90 = vrot.lane.b32.xlu2 %v89_v13, %s376_s24 }
  0x6e   :  { %v94_v14 = vld.sshfl [vmem:[#allocation1 + $0x10] sm:$0xff pattern:$0x73625140] }
  0x6f   :  { %95 = vrot.lane.b32.xlu1 %v94_v14, %s377_s25  ;;  %98 = vst [vmem:[#allocation1] ss:$4 sm:$0xff] %v400_v0 }
  0x76   :  { %v99_v15 = vld.sshfl [vmem:[#allocation1 + $0x10] sm:$0xff pattern:$0x73625140] }
  0x77   :  { %100 = vrot.lane.b32.xlu0 %v99_v15, %s378_s26  ;;  %103 = vst [vmem:[#allocation1] ss:$4 sm:$0xff] %v400_v0 }
  0x7e   :  { %v104_v16 = vld.sshfl [vmem:[#allocation1 + $0x10] sm:$0xff pattern:$0x73625140] }
  0x7f   :  { %136 = vst [vmem:[#allocation1] ss:$4 sm:$0xff] %v400_v0  ;;  %105 = vrot.lane.b32.xlu2 %v104_v16, %s379_s27 }
  0x81   :  { %v31_v29 = vpop.permute.xlu0 %30 }
  0x82   :  { %v109_v43 = vsel %vm108_vm0, %v400_v0, %v31_v29 }
  0x86   :  { %v137_v17 = vld.sshfl [vmem:[#allocation1] sm:$0xff pattern:$0x73625140] }
  0x87   :  { %138 = vrot.lane.b32.xlu0 %v137_v17, %s366_s0  ;;  %141 = vst [vmem:[#allocation1] ss:$4 sm:$0xff] %v400_v0 }
  0x89   :  { %v52_v27 = vpop.permute.xlu2 %51  ;;  %v36_v33 = vpop.permute.xlu0 %35 }
  0x8a   :  { %v111_v45 = vsel %vm110_vm1, %v109_v43, %v36_v33 }
  0x8e   :  { %v142_v18 = vld.sshfl [vmem:[#allocation1] sm:$0xff pattern:$0x73625140] }
  0x8f   :  { %143 = vrot.lane.b32.xlu1 %v142_v18, %s368_s16  ;;  %146 = vst [vmem:[#allocation1] ss:$4 sm:$0xff] %v400_v0 }
  0x91   :  { %v41_v28 = vpop.permute.xlu1 %40  ;;  %v54_v31 = vpop.permute.xlu2 %53 }
  0x92   :  { %v113_v50 = vsel %vm112_vm2, %v111_v45, %v41_v28  ;;  %v56_v54 = vsel %vm55_vm5, %v52_v27, %v54_v31 }
  0x96   :  { %v147_v19 = vld.sshfl [vmem:[#allocation1] sm:$0xff pattern:$0x73625140] }
  0x97   :  { %151 = vst [vmem:[#allocation1] ss:$4 sm:$0xff] %v400_v0  ;;  %148 = vrot.lane.b32.xlu2 %v147_v19, %s370_s18 }
  0x99   :  { %v46_v32 = vpop.permute.xlu1 %45 }
  0x9a   :  { %v115_v55 = vsel %vm114_vm3, %v113_v50, %v46_v32 }
  0x9b   :  { %v117_v58 = vsel %vm116_vm4, %v115_v55, %v56_v54 }
  0x9e   :  { %v152_v20 = vld.sshfl [vmem:[#allocation1] sm:$0xff pattern:$0x73625140] }
  0x9f   :  { %153 = vrot.lane.b32.xlu0 %v152_v20, %s372_s20  ;;  %156 = vst [vmem:[#allocation1] ss:$4 sm:$0xff] %v400_v0 }
  0xa1   :  { %v71_v35 = vpop.permute.xlu2 %70 }
  0xa6   :  { %v157_v21 = vld.sshfl [vmem:[#allocation1] sm:$0xff pattern:$0x73625140] }
  0xa7   :  { %158 = vrot.lane.b32.xlu1 %v157_v21, %s374_s22  ;;  %161 = vst [vmem:[#allocation1] ss:$4 sm:$0xff] %v400_v0 }
  0xa9   :  { %v61_v37 = vpop.permute.xlu0 %60 }
  0xaa   :  { %v119_v61 = vsel %vm118_vm6, %v117_v58, %v61_v37 }
  0xae   :  { %v162_v22 = vld.sshfl [vmem:[#allocation1 + $0x8] sm:$0xff pattern:$0x73625140] }
  0xaf   :  { %166 = vst [vmem:[#allocation1] ss:$4 sm:$0xff] %v400_v0  ;;  %163 = vrot.lane.b32.xlu2 %v162_v22, %s376_s24 }
  0xb1   :  { %v66_v36 = vpop.permute.xlu1 %65 }
  0xb2   :  { %v121_v63 = vsel %vm120_vm7, %v119_v61, %v66_v36 }
  0xb6   :  { %v167_v23 = vld.sshfl [vmem:[#allocation1 + $0x8] sm:$0xff pattern:$0x73625140] }
  0xb7   :  { %168 = vrot.lane.b32.xlu0 %v167_v23, %s378_s26  ;;  %171 = vst [vmem:[#allocation1] ss:$4 sm:$0xff] %v400_v0 }
  0xb9   :  { %v86_v39 = vpop.permute.xlu2 %85 }
  0xbe   :  { %v439_v24 = vld.sshfl [vmem:[#allocation1 + $0x8] sm:$0xff pattern:$0x73625140] }
  0xbf   :  { %174 = vst [vmem:[#allocation1] ss:$4 sm:$0xff] %v400_v0 }
  0xc1   :  { %v76_v41 = vpop.permute.xlu0 %75  ;;  %v91_v48 = vpop.permute.xlu2 %90 }
  0xc2   :  { %v122_v42 = vsel %vm108_vm0, %v71_v35, %v76_v41 }
  0xc6   :  { %v175_v25 = vld.sshfl [vmem:[#allocation1 + $0x8] sm:$0xff pattern:$0x73625140] }
  0xc7   :  { %176 = vrot.lane.b32.xlu1 %v175_v25, %s366_s0  ;;  %179 = vst [vmem:[#allocation1] ss:$4 sm:$0xff] %v400_v0 }
  0xc9   :  { %v81_v40 = vpop.permute.xlu1 %80 }
  0xca   :  { %v123_v44 = vsel %vm110_vm1, %v122_v42, %v81_v40 }
  0xcb   :  { %v124_v46 = vsel %vm112_vm2, %v123_v44, %v86_v39 }
  0xcc   :  { %v125_v51 = vsel %vm114_vm3, %v124_v46, %v91_v48 }
  0xce   :  { %v180_v26 = vld.sshfl [vmem:[#allocation1 + $0x8] sm:$0xff pattern:$0x73625140] }
  0xcf   :  { %181 = vrot.lane.b32.xlu0 %v180_v26, %s368_s16  ;;  %184 = vst [vmem:[#allocation1] ss:$4 sm:$0xff] %v400_v0 }
  0xd6   :  { %v185_v30 = vld.sshfl [vmem:[#allocation1 + $0x10] sm:$0xff pattern:$0x73625140] }
  0xd7   :  { %189 = vst [vmem:[#allocation1] ss:$4 sm:$0xff] %v400_v0  ;;  %186 = vrot.lane.b32.xlu2 %v185_v30, %s370_s18 }
  0xd9   :  { %v106_v59 = vpop.permute.xlu2 %105 }
  0xde   :  { %v190_v34 = vld.sshfl [vmem:[#allocation1 + $0x10] sm:$0xff pattern:$0x73625140] }
  0xdf   :  { %191 = vrot.lane.b32.xlu1 %v190_v34, %s372_s20  ;;  %194 = vst [vmem:[#allocation1] ss:$4 sm:$0xff] %v400_v0 }
  0xe1   :  { %v96_v49 = vpop.permute.xlu1 %95 }
  0xe2   :  { %v126_v52 = vsel %vm116_vm4, %v125_v51, %v96_v49 }
  0xe6   :  { %v195_v38 = vld.sshfl [vmem:[#allocation1 + $0x10] sm:$0xff pattern:$0x73625140] }
  0xe7   :  { %196 = vrot.lane.b32.xlu0 %v195_v38, %s374_s22  ;;  %199 = vst [vmem:[#allocation1] ss:$4 sm:$0xff] %v400_v0 }
  0xe9   :  { %v101_v53 = vpop.permute.xlu0 %100 }
  0xea   :  { %v127_v56 = vsel %vm118_vm6, %v126_v52, %v101_v53 }
  0xeb   :  { %v128_v60 = vsel %vm120_vm7, %v127_v56, %v106_v59 }
  0xec   :  { %v131_v62 = vrot.slane %v128_v60, 6 }
  0xee   :  { %v200_v47 = vld.sshfl [vmem:[#allocation1 + $0x10] sm:$0xff pattern:$0x73625140]  ;;  %v133_v1 = vsel %vm132_vm8, %v121_v63, %v131_v62 }
  0xef   :  { %201 = vrot.lane.b32.xlu1 %v200_v47, %s376_s24  ;;  %204 = vst [vmem:[#allocation1] ss:$4 sm:$0xff] %v400_v0 }
  0xf0   :  { %135 = vst [vmem:[#allocation5] sm:$0xf] %v133_v1 }
  0xf1   :  { %245 = dma.vmem_to_hbm [thread:$0]  %s241_s29, 64, %s243_s4, [#allocation4]   ;;  %v149_v5 = vpop.permute.xlu2 %148 }
  0xf6   :  { %v205_v57 = vld.sshfl [vmem:[#allocation1 + $0x10] sm:$0xff pattern:$0x73625140] }
  0xf7   :  { %206 = vrot.lane.b32.xlu2 %v205_v57, %s378_s26  ;;  %209 = vst [vmem:[#allocation1] ss:$4 sm:$0xff] %v400_v0 }
  0xf9   :  { %v139_v0 = vpop.permute.xlu0 %138 }
  0xfe   :  { %v210_v27 = vld.sshfl [vmem:[#allocation1 + $0x10] sm:$0xff pattern:$0x73625140] }
 0x101   :  { %v144_v2 = vpop.permute.xlu1 %143 }
 0x102   :  { %v213_v4 = vsel %vm212_vm9, %v139_v0, %v144_v2 }
 0x103   :  { %v214_v6 = vsel %vm108_vm0, %v213_v4, %v149_v5 }
 0x109   :  { %v164_v11 = vpop.permute.xlu2 %163 }
 0x111   :  { %v154_v3 = vpop.permute.xlu0 %153 }
 0x112   :  { %v216_v8 = vsel %vm215_vm10, %v214_v6, %v154_v3 }
 0x119   :  { %v159_v7 = vpop.permute.xlu1 %158 }
 0x11a   :  { %v217_v10 = vsel %vm110_vm1, %v216_v8, %v159_v7 }
 0x11b   :  { %v219_v12 = vsel %vm218_vm11, %v217_v10, %v164_v11 }
 0x129   :  { %v169_v9 = vpop.permute.xlu0 %168 }
 0x12a   :  { %v220_v14 = vsel %vm112_vm2, %v219_v12, %v169_v9 }
 0x12b   :  { %v222_v15 = vsel %vm221_vm12, %v220_v14, %v439_v24 }
 0x131   :  { %v187_v17 = vpop.permute.xlu2 %186 }
 0x139   :  { %v177_v13 = vpop.permute.xlu1 %176 }
 0x13a   :  { %v223_v18 = vsel %vm114_vm3, %v222_v15, %v177_v13 }
 0x141   :  { %v182_v16 = vpop.permute.xlu0 %181 }
 0x142   :  { %v225_v20 = vsel %vm224_vm13, %v223_v18, %v182_v16 }
 0x143   :  { %v226_v22 = vsel %vm116_vm4, %v225_v20, %v187_v17 }
 0x151   :  { %v192_v19 = vpop.permute.xlu1 %191  ;;  %v207_v25 = vpop.permute.xlu2 %206 }
 0x152   :  { %v227_v23 = vsel %vm55_vm5, %v226_v22, %v192_v19 }
 0x159   :  { %v197_v21 = vpop.permute.xlu0 %196 }
 0x15a   :  { %v228_v24 = vsel %vm118_vm6, %v227_v23, %v197_v21 }
 0x161   :  { %v202_v26 = vpop.permute.xlu1 %201 }
 0x162   :  { %v230_v28 = vsel %vm229_vm14, %v228_v24, %v202_v26 }
 0x163   :  { %v231_v29 = vsel %vm120_vm7, %v230_v28, %v207_v25 }
 0x164   :  { %v233_v30 = vsel %vm232_vm15, %v231_v29, %v210_v27 }
 0x165   :  { %234 = vst [vmem:[#allocation6] sm:$0x3] %v233_v30 }
 0x166   :  { %256 = dma.vmem_to_hbm [thread:$0]  %s252_s5, 32, %s254_s8, [#allocation7]  }
 0x167   :  { %360 = dma.done.wait [#allocation4], 64  }
 0x168   :  { %361 = vsyncadd [#allocation4], 4294967232 }
 0x169   :  { %362 = dma.done.wait [#allocation7], 32  }
 0x16a   :  { %363 = vsyncadd [#allocation7], 4294967264 }
 0x16b   :  { %265 = vsyncpa [#allocation3], 1 }
 0x16c   :  { %266 = vsyncpa [#allocation4], 1 }
 0x16d   :  { %267 = vsyncpa [#allocation7], 1 }

</bundles_post_ra>
